<compile_context>
chip_gen: v7x
topology: tpu7x:2x2x1
jax: 0.10.0
libtpu: 0.0.40
codegen_flags: <defaults>
</compile_context>

<pallas_src>
import jax
import jax.numpy as jnp
from jax import lax
from jax.experimental import pallas as pl
from jax.experimental.pallas import tpu as pltpu

SIGMA_MIN = 1e-6


def cfm_kernel(t_sref, plen_sref, xlen_sref,           # SMEM per-batch scalars (B,)
               x1_ref, z_ref, mu_ref,                  # (C, tT) VMEM tiles
               bias_ref,                               # (C, 1) per-batch bias
               wy_ref, wp_ref, wm_ref,                 # (C, C) estimator weights
               y_ref, loss_ref):                       # (C, tT) / (1, tT) outputs
    b = pl.program_id(0)
    j = pl.program_id(1)
    C, tT = x1_ref.shape

    t_b = t_sref[b]                                    # f32 scalar
    plen = plen_sref[b]                                # i32 scalar
    xlen = xlen_sref[b]

    x1 = x1_ref[...]
    z = z_ref[...]
    mu = mu_ref[...]

    one_m_sig = 1.0 - SIGMA_MIN
    # flow-matching interpolation / target velocity
    y = (1.0 - one_m_sig * t_b) * z + t_b * x1
    u = x1 - one_m_sig * z

    # frame index within the batch item, generated in-kernel
    frame = lax.broadcasted_iota(jnp.int32, (1, tT), 1) + j * tT
    pmask = frame < plen                               # prompt region
    prompt = jnp.where(pmask, x1, 0.0)
    y = jnp.where(pmask, 0.0, y)

    # synthetic estimator: three small MXU dots, f32 accumulation, hoisted bias.
    est = (jnp.dot(wy_ref[...], y, preferred_element_type=jnp.float32)
           + jnp.dot(wp_ref[...], prompt, preferred_element_type=jnp.float32)
           + jnp.dot(wm_ref[...], mu, preferred_element_type=jnp.float32))
    est = jnp.tanh(est + bias_ref[...])

    # per-batch-normalised masked MSE: sublane reduce first, then lane weights.
    diff = est - u
    rmask = jnp.logical_and(frame >= plen, frame < xlen)            # (1, tT)
    n_el = (C * jnp.maximum(xlen - plen, 0)).astype(jnp.float32)
    w_lane = jnp.where(rmask, 1.0 / jnp.maximum(n_el, 1.0), 0.0)    # (1, tT)
    loss_ref[...] = jnp.sum(diff * diff, axis=0, keepdims=True) * w_lane

    y_ref[...] = est + one_m_sig * z


def basecfm_forward(x1, z, t, mu, style, x_lens, prompt_lens,
                    wy, wp, wm, ws, *, lane_tile=8192):
    B, C, T = x1.shape

    # per-batch scalars for SMEM scalar-prefetch (lengths clamped to T)
    t_vec = t.astype(jnp.float32).reshape(B)
    plen_vec = jnp.clip(prompt_lens.astype(jnp.int32), 0, T)
    xlen_vec = jnp.clip(x_lens.astype(jnp.int32), 0, T)

    # lane-dense tile over mel frames; pad T up to a tile multiple (padded
    # frames have frame >= x_len, so they drop out of the loss and prompt mask)
    tile = min(lane_tile, pl.cdiv(T, 128) * 128)
    T_pad = pl.cdiv(T, tile) * tile
    if T_pad != T:
        pad = [(0, 0), (0, 0), (0, T_pad - T)]
        x1p = jnp.pad(x1, pad)
        zp = jnp.pad(z, pad)
        mup = jnp.pad(mu, pad)
    else:
        x1p, zp, mup = x1, z, mu
    n_t = T_pad // tile

    # hoisted style projection + timestep bias for the synthetic estimator
    bias = (style.astype(jnp.float32) @ ws + t_vec[:, None]).reshape(B, C, 1)

    data_spec = pl.BlockSpec((None, C, tile), lambda b, j, *_: (b, 0, j))
    const_w = pl.BlockSpec((C, C), lambda b, j, *_: (0, 0))

    y_pad, loss_rows = pl.pallas_call(
        cfm_kernel,
        grid_spec=pltpu.PrefetchScalarGridSpec(
            num_scalar_prefetch=3,
            grid=(B, n_t),
            in_specs=[
                data_spec,                                              # x1
                data_spec,                                              # z
                data_spec,                                              # mu
                pl.BlockSpec((None, C, 1), lambda b, j, *_: (b, 0, 0)),  # bias
                const_w,                                                # wy
                const_w,                                                # wp
                const_w,                                                # wm
            ],
            out_specs=[
                data_spec,                                              # y_out
                pl.BlockSpec((None, 1, tile), lambda b, j, *_: (b, 0, j)),
            ],
        ),
        out_shape=(
            jax.ShapeDtypeStruct((B, C, T_pad), jnp.float32),
            jax.ShapeDtypeStruct((B, 1, T_pad), jnp.float32),
        ),
        compiler_params=pltpu.CompilerParams(
            dimension_semantics=("parallel", "parallel")),
    )(t_vec, plen_vec, xlen_vec,
      x1p.astype(jnp.float32), zp.astype(jnp.float32), mup.astype(jnp.float32),
      bias, wy.astype(jnp.float32), wp.astype(jnp.float32), wm.astype(jnp.float32))

    loss = jnp.sum(loss_rows) / B
    y_out = y_pad[:, :, :T]
    return loss, y_out


if __name__ == "__main__":
    B, C, T, S = 2, 8, 128, 32   # batch, n_feats(in_channels), mel frames, style dim

    key = jax.random.PRNGKey(0)
    k1, k2, k3, k4, k5, k6, k7, k8, k9 = jax.random.split(key, 9)

    x1 = jax.random.normal(k1, (B, C, T), jnp.float32)      # target mel
    mu = jax.random.normal(k2, (B, C, T), jnp.float32)      # encoder output
    style = jax.random.normal(k3, (B, S), jnp.float32)      # style embedding
    z = jax.random.normal(k4, (B, C, T), jnp.float32)       # flow-matching noise
    t = jax.random.uniform(k5, (B,), jnp.float32)           # random timesteps

    x_lens = jnp.array([128, 96], dtype=jnp.int32)
    prompt_lens = jnp.array([32, 48], dtype=jnp.int32)

    # deterministic synthetic estimator parameters
    wy = 0.1 * jax.random.normal(k6, (C, C), jnp.float32)
    wp = 0.1 * jax.random.normal(k7, (C, C), jnp.float32)
    wm = 0.1 * jax.random.normal(k8, (C, C), jnp.float32)
    ws = 0.1 * jax.random.normal(k9, (S, C), jnp.float32)

    fwd = jax.jit(basecfm_forward)
    loss, y_out = fwd(x1, z, t, mu, style, x_lens, prompt_lens, wy, wp, wm, ws)
    jax.block_until_ready((loss, y_out))

    assert y_out.shape == (B, C, T)
    assert jnp.isfinite(loss) and jnp.all(jnp.isfinite(y_out))
    print("KERNEL_OK")
</pallas_src>

<mosaic_0001>
module attributes {stable_mosaic.version = 11 : i64} {
  func.func @cfm_kernel(%arg0: i32, %arg1: i32, %arg2: memref<2xf32, #tpu.memory_space<smem>>, %arg3: memref<2xi32, #tpu.memory_space<smem>>, %arg4: memref<2xi32, #tpu.memory_space<smem>>, %arg5: memref<1x8x128xf32, #tpu.memory_space<vmem>>, %arg6: memref<1x8x128xf32, #tpu.memory_space<vmem>>, %arg7: memref<1x8x128xf32, #tpu.memory_space<vmem>>, %arg8: memref<1x8x1xf32, #tpu.memory_space<vmem>>, %arg9: memref<8x8xf32, #tpu.memory_space<vmem>>, %arg10: memref<8x8xf32, #tpu.memory_space<vmem>>, %arg11: memref<8x8xf32, #tpu.memory_space<vmem>>, %arg12: memref<1x8x128xf32, #tpu.memory_space<vmem>>, %arg13: memref<1x1x128xf32, #tpu.memory_space<vmem>>) attributes {dimension_semantics = [#tpu.dimension_semantics<parallel>, #tpu.dimension_semantics<parallel>], iteration_bounds = array<i64: 2, 1>, scalar_prefetch = 3 : i64, scratch_operands = 0 : i64, tpu.core_type = #tpu.core_type<tc>, window_params = [{transform_indices = @transform_0, window_bounds = array<i64: 1, 8, 128>}, {transform_indices = @transform_1, window_bounds = array<i64: 1, 8, 128>}, {transform_indices = @transform_2, window_bounds = array<i64: 1, 8, 128>}, {transform_indices = @transform_3, window_bounds = array<i64: 1, 8, 1>}, {pipeline_mode = #tpu.pipeline_mode<synchronous>, transform_indices = @transform_4, window_bounds = array<i64: 8, 8>}, {pipeline_mode = #tpu.pipeline_mode<synchronous>, transform_indices = @transform_5, window_bounds = array<i64: 8, 8>}, {pipeline_mode = #tpu.pipeline_mode<synchronous>, transform_indices = @transform_6, window_bounds = array<i64: 8, 8>}, {transform_indices = @transform_7, window_bounds = array<i64: 1, 8, 128>}, {transform_indices = @transform_8, window_bounds = array<i64: 1, 1, 128>}]} {
    %0 = arith.index_cast %arg0 : i32 to index
    %1 = memref.load %arg2[%0] : memref<2xf32, #tpu.memory_space<smem>>
    %2 = arith.index_cast %arg0 : i32 to index
    %3 = memref.load %arg3[%2] : memref<2xi32, #tpu.memory_space<smem>>
    %4 = arith.index_cast %arg0 : i32 to index
    %5 = memref.load %arg4[%4] : memref<2xi32, #tpu.memory_space<smem>>
    %c0 = arith.constant 0 : index
    %c0_0 = arith.constant 0 : index
    %c0_1 = arith.constant 0 : index
    %6 = vector.load %arg5[%c0, %c0_0, %c0_1] : memref<1x8x128xf32, #tpu.memory_space<vmem>>, vector<1x8x128xf32>
    %7 = vector.shape_cast %6 : vector<1x8x128xf32> to vector<8x128xf32>
    %c0_2 = arith.constant 0 : index
    %c0_3 = arith.constant 0 : index
    %c0_4 = arith.constant 0 : index
    %8 = vector.load %arg6[%c0_2, %c0_3, %c0_4] : memref<1x8x128xf32, #tpu.memory_space<vmem>>, vector<1x8x128xf32>
    %9 = vector.shape_cast %8 : vector<1x8x128xf32> to vector<8x128xf32>
    %c0_5 = arith.constant 0 : index
    %c0_6 = arith.constant 0 : index
    %c0_7 = arith.constant 0 : index
    %10 = vector.load %arg7[%c0_5, %c0_6, %c0_7] : memref<1x8x128xf32, #tpu.memory_space<vmem>>, vector<1x8x128xf32>
    %11 = vector.shape_cast %10 : vector<1x8x128xf32> to vector<8x128xf32>
    %cst = arith.constant 0.999998986 : f32
    %12 = arith.mulf %cst, %1 : f32
    %cst_8 = arith.constant 1.000000e+00 : f32
    %13 = arith.subf %cst_8, %12 : f32
    %14 = vector.broadcast %13 : f32 to vector<8x128xf32>
    %15 = arith.mulf %14, %9 : vector<8x128xf32>
    %16 = vector.broadcast %1 : f32 to vector<8x128xf32>
    %17 = arith.mulf %16, %7 : vector<8x128xf32>
    %18 = arith.addf %15, %17 : vector<8x128xf32>
    %cst_9 = arith.constant 0.999998986 : f32
    %19 = vector.broadcast %cst_9 : f32 to vector<8x128xf32>
    %20 = arith.mulf %19, %9 : vector<8x128xf32>
    %21 = arith.subf %7, %20 : vector<8x128xf32>
    %22 = tpu.iota {dimensions = array<i32: 1>} : vector<1x128xi32>
    %c128_i32 = arith.constant 128 : i32
    %23 = arith.muli %arg1, %c128_i32 : i32
    %24 = vector.broadcast %23 : i32 to vector<1x128xi32>
    %25 = arith.addi %22, %24 : vector<1x128xi32>
    %26 = vector.broadcast %3 : i32 to vector<1x128xi32>
    %27 = arith.cmpi slt, %25, %26 : vector<1x128xi32>
    %cst_10 = arith.constant 0.000000e+00 : f32
    %28 = vector.shape_cast %27 : vector<1x128xi1> to vector<1x128xi1>
    %29 = vector.broadcast %28 : vector<1x128xi1> to vector<8x128xi1>
    %30 = vector.broadcast %cst_10 : f32 to vector<8x128xf32>
    %31 = arith.select %29, %7, %30 : vector<8x128xi1>, vector<8x128xf32>
    %cst_11 = arith.constant 0.000000e+00 : f32
    %32 = vector.shape_cast %27 : vector<1x128xi1> to vector<1x128xi1>
    %33 = vector.broadcast %32 : vector<1x128xi1> to vector<8x128xi1>
    %34 = vector.broadcast %cst_11 : f32 to vector<8x128xf32>
    %35 = arith.select %33, %34, %18 : vector<8x128xi1>, vector<8x128xf32>
    %c0_12 = arith.constant 0 : index
    %c0_13 = arith.constant 0 : index
    %36 = vector.load %arg9[%c0_12, %c0_13] : memref<8x8xf32, #tpu.memory_space<vmem>>, vector<8x8xf32>
    %cst_14 = arith.constant dense<0.000000e+00> : vector<8x128xf32>
    %37 = tpu.matmul %36, %35, %cst_14 {dimension_numbers = #tpu.dot_dimension_numbers<[1], [0], [0], [1], [0, 0, 1, 1], [], []>} : vector<8x8xf32>, vector<8x128xf32>, vector<8x128xf32> -> vector<8x128xf32>
    %c0_15 = arith.constant 0 : index
    %c0_16 = arith.constant 0 : index
    %38 = vector.load %arg10[%c0_15, %c0_16] : memref<8x8xf32, #tpu.memory_space<vmem>>, vector<8x8xf32>
    %cst_17 = arith.constant dense<0.000000e+00> : vector<8x128xf32>
    %39 = tpu.matmul %38, %31, %cst_17 {dimension_numbers = #tpu.dot_dimension_numbers<[1], [0], [0], [1], [0, 0, 1, 1], [], []>} : vector<8x8xf32>, vector<8x128xf32>, vector<8x128xf32> -> vector<8x128xf32>
    %40 = arith.addf %37, %39 : vector<8x128xf32>
    %c0_18 = arith.constant 0 : index
    %c0_19 = arith.constant 0 : index
    %41 = vector.load %arg11[%c0_18, %c0_19] : memref<8x8xf32, #tpu.memory_space<vmem>>, vector<8x8xf32>
    %cst_20 = arith.constant dense<0.000000e+00> : vector<8x128xf32>
    %42 = tpu.matmul %41, %11, %cst_20 {dimension_numbers = #tpu.dot_dimension_numbers<[1], [0], [0], [1], [0, 0, 1, 1], [], []>} : vector<8x8xf32>, vector<8x128xf32>, vector<8x128xf32> -> vector<8x128xf32>
    %43 = arith.addf %40, %42 : vector<8x128xf32>
    %c0_21 = arith.constant 0 : index
    %c0_22 = arith.constant 0 : index
    %c0_23 = arith.constant 0 : index
    %44 = vector.load %arg8[%c0_21, %c0_22, %c0_23] : memref<1x8x1xf32, #tpu.memory_space<vmem>>, vector<1x8x1xf32>
    %45 = vector.shape_cast %44 : vector<1x8x1xf32> to vector<8x1xf32>
    %46 = vector.broadcast %45 : vector<8x1xf32> to vector<8x128xf32>
    %47 = arith.addf %43, %46 : vector<8x128xf32>
    %48 = math.tanh %47 : vector<8x128xf32>
    %49 = arith.subf %48, %21 : vector<8x128xf32>
    %50 = vector.broadcast %3 : i32 to vector<1x128xi32>
    %51 = arith.cmpi sge, %25, %50 : vector<1x128xi32>
    %52 = vector.broadcast %5 : i32 to vector<1x128xi32>
    %53 = arith.cmpi slt, %25, %52 : vector<1x128xi32>
    %54 = arith.andi %51, %53 : vector<1x128xi1>
    %55 = arith.subi %5, %3 : i32
    %c0_i32 = arith.constant 0 : i32
    %56 = arith.maxsi %55, %c0_i32 : i32
    %c8_i32 = arith.constant 8 : i32
    %57 = arith.muli %c8_i32, %56 : i32
    %58 = arith.sitofp %57 : i32 to f32
    %cst_24 = arith.constant 1.000000e+00 : f32
    %59 = arith.maximumf %58, %cst_24 : f32
    %cst_25 = arith.constant 1.000000e+00 : f32
    %60 = arith.divf %cst_25, %59 : f32
    %cst_26 = arith.constant 0.000000e+00 : f32
    %61 = vector.broadcast %60 : f32 to vector<1x128xf32>
    %62 = vector.broadcast %cst_26 : f32 to vector<1x128xf32>
    %63 = arith.select %54, %61, %62 : vector<1x128xi1>, vector<1x128xf32>
    %64 = arith.mulf %49, %49 : vector<8x128xf32>
    %cst_27 = arith.constant dense<0.000000e+00> : vector<128xf32>
    %65 = vector.multi_reduction <add>, %64, %cst_27 [0] : vector<8x128xf32> to vector<128xf32>
    %66 = vector.shape_cast %65 : vector<128xf32> to vector<1x128xf32>
    %67 = arith.mulf %66, %63 : vector<1x128xf32>
    %c0_28 = arith.constant 0 : index
    %c0_29 = arith.constant 0 : index
    %c0_30 = arith.constant 0 : index
    %68 = vector.load %arg13[%c0_28, %c0_29, %c0_30] : memref<1x1x128xf32, #tpu.memory_space<vmem>>, vector<1x1x128xf32>
    %69 = vector.shape_cast %68 : vector<1x1x128xf32> to vector<1x128xf32>
    %70 = vector.shape_cast %67 : vector<1x128xf32> to vector<1x1x128xf32>
    tpu.vector_store %arg13[%c0_28, %c0_29, %c0_30], %70 {strides = array<i32>} : memref<1x1x128xf32, #tpu.memory_space<vmem>>, vector<1x1x128xf32>,
    %cst_31 = arith.constant 0.999998986 : f32
    %71 = vector.broadcast %cst_31 : f32 to vector<8x128xf32>
    %72 = arith.mulf %71, %9 : vector<8x128xf32>
    %73 = arith.addf %48, %72 : vector<8x128xf32>
    %c0_32 = arith.constant 0 : index
    %c0_33 = arith.constant 0 : index
    %c0_34 = arith.constant 0 : index
    %74 = vector.load %arg12[%c0_32, %c0_33, %c0_34] : memref<1x8x128xf32, #tpu.memory_space<vmem>>, vector<1x8x128xf32>
    %75 = vector.shape_cast %74 : vector<1x8x128xf32> to vector<8x128xf32>
    %76 = vector.shape_cast %73 : vector<8x128xf32> to vector<1x8x128xf32>
    tpu.vector_store %arg12[%c0_32, %c0_33, %c0_34], %76 {strides = array<i32>} : memref<1x8x128xf32, #tpu.memory_space<vmem>>, vector<1x8x128xf32>,
    return
  }
  func.func @transform_0(%arg0: i32, %arg1: i32, %arg2: memref<2xf32, #tpu.memory_space<smem>>, %arg3: memref<2xi32, #tpu.memory_space<smem>>, %arg4: memref<2xi32, #tpu.memory_space<smem>>) -> (i32, i32, i32) {
    %c0_i32 = arith.constant 0 : i32
    %c0_i32_0 = arith.constant 0 : i32
    return %arg0, %c0_i32, %arg1 : i32, i32, i32
  }
  func.func @transform_1(%arg0: i32, %arg1: i32, %arg2: memref<2xf32, #tpu.memory_space<smem>>, %arg3: memref<2xi32, #tpu.memory_space<smem>>, %arg4: memref<2xi32, #tpu.memory_space<smem>>) -> (i32, i32, i32) {
    %c0_i32 = arith.constant 0 : i32
    %c0_i32_0 = arith.constant 0 : i32
    return %arg0, %c0_i32, %arg1 : i32, i32, i32
  }
  func.func @transform_2(%arg0: i32, %arg1: i32, %arg2: memref<2xf32, #tpu.memory_space<smem>>, %arg3: memref<2xi32, #tpu.memory_space<smem>>, %arg4: memref<2xi32, #tpu.memory_space<smem>>) -> (i32, i32, i32) {
    %c0_i32 = arith.constant 0 : i32
    %c0_i32_0 = arith.constant 0 : i32
    return %arg0, %c0_i32, %arg1 : i32, i32, i32
  }
  func.func @transform_3(%arg0: i32, %arg1: i32, %arg2: memref<2xf32, #tpu.memory_space<smem>>, %arg3: memref<2xi32, #tpu.memory_space<smem>>, %arg4: memref<2xi32, #tpu.memory_space<smem>>) -> (i32, i32, i32) {
    %c0_i32 = arith.constant 0 : i32
    %c0_i32_0 = arith.constant 0 : i32
    %c0_i32_1 = arith.constant 0 : i32
    return %arg0, %c0_i32, %c0_i32_0 : i32, i32, i32
  }
  func.func @transform_4(%arg0: i32, %arg1: i32, %arg2: memref<2xf32, #tpu.memory_space<smem>>, %arg3: memref<2xi32, #tpu.memory_space<smem>>, %arg4: memref<2xi32, #tpu.memory_space<smem>>) -> (i32, i32) {
    %c0_i32 = arith.constant 0 : i32
    %c0_i32_0 = arith.constant 0 : i32
    %c0_i32_1 = arith.constant 0 : i32
    return %c0_i32, %c0_i32_0 : i32, i32
  }
  func.func @transform_5(%arg0: i32, %arg1: i32, %arg2: memref<2xf32, #tpu.memory_space<smem>>, %arg3: memref<2xi32, #tpu.memory_space<smem>>, %arg4: memref<2xi32, #tpu.memory_space<smem>>) -> (i32, i32) {
    %c0_i32 = arith.constant 0 : i32
    %c0_i32_0 = arith.constant 0 : i32
    %c0_i32_1 = arith.constant 0 : i32
    return %c0_i32, %c0_i32_0 : i32, i32
  }
  func.func @transform_6(%arg0: i32, %arg1: i32, %arg2: memref<2xf32, #tpu.memory_space<smem>>, %arg3: memref<2xi32, #tpu.memory_space<smem>>, %arg4: memref<2xi32, #tpu.memory_space<smem>>) -> (i32, i32) {
    %c0_i32 = arith.constant 0 : i32
    %c0_i32_0 = arith.constant 0 : i32
    %c0_i32_1 = arith.constant 0 : i32
    return %c0_i32, %c0_i32_0 : i32, i32
  }
  func.func @transform_7(%arg0: i32, %arg1: i32, %arg2: memref<2xf32, #tpu.memory_space<smem>>, %arg3: memref<2xi32, #tpu.memory_space<smem>>, %arg4: memref<2xi32, #tpu.memory_space<smem>>) -> (i32, i32, i32) {
    %c0_i32 = arith.constant 0 : i32
    %c0_i32_0 = arith.constant 0 : i32
    return %arg0, %c0_i32, %arg1 : i32, i32, i32
  }
  func.func @transform_8(%arg0: i32, %arg1: i32, %arg2: memref<2xf32, #tpu.memory_space<smem>>, %arg3: memref<2xi32, #tpu.memory_space<smem>>, %arg4: memref<2xi32, #tpu.memory_space<smem>>) -> (i32, i32, i32) {
    %c0_i32 = arith.constant 0 : i32
    %c0_i32_0 = arith.constant 0 : i32
    return %arg0, %c0_i32, %arg1 : i32, i32, i32
  }
}

</mosaic_0001>

<bundles_post_ra>
// kernel: basecfm_forward.1
= control target key start
LH: loop header
LB: loop body
LE: loop exit
PB: predicated region body
PF: predicated region fallthrough
CT: control target
= control target key end

     0   :  { %s1362_s0 = inlined_call_operand.vmem [shape: f32[2], index: 0, kind: input, shape index: {}]   ;;  %s1363_s3 = inlined_call_operand.vmem [shape: f32[2,8,128], index: 3, kind: input, shape index: {}]   ;;  %s1364_s4 = inlined_call_operand.vmem [shape: f32[2,8,128], index: 4, kind: input, shape index: {}]   ;;  %s1365_s5 = inlined_call_operand.vmem [shape: f32[2,8,128], index: 5, kind: input, shape index: {}]   ;;  %s1366_s6 = inlined_call_operand.vmem [shape: f32[2,8,1], index: 6, kind: input, shape index: {}]   ;;  %s1367_s7 = inlined_call_operand.vmem [shape: f32[8,8], index: 7, kind: input, shape index: {}]   ;;  %s1368_s8 = inlined_call_operand.vmem [shape: f32[8,8], index: 8, kind: input, shape index: {}]   ;;  %s1369_s9 = inlined_call_operand.vmem [shape: f32[8,8], index: 9, kind: input, shape index: {}]   ;;  %s1370_s10 = inlined_call_operand.hbm [shape: f32[2,8,128], index: 10, kind: output, shape index: {0}]   ;;  %s1371_s11 = inlined_call_operand.vmem [shape: f32[2,1,128], index: 11, kind: output, shape index: {1}]   ;;  %s1372_s1 = inlined_call_operand.vmem [shape: s32[2], index: 1, kind: input, shape index: {}]   ;;  %s1373_s2 = inlined_call_operand.vmem [shape: s32[2], index: 2, kind: input, shape index: {}]  }
   0x1   :  { %s17_s19 = sshll.u32 %s1362_s0, 4  ;;  %s21_s22 = sshll.u32 %s1372_s1, 4  ;;  %s18_s19 = int_to_ptr.vmem [resolvable:$true] %s17_s19  ;;  %s22_s22 = int_to_ptr.vmem [resolvable:$true] %s21_s22 }
   0x2   :  { %s992_s23 = scalar_lea.vmem %s18_s19, 16  ;;  %p997_p1 = scmp.lt.s32.totalorder %s18_s19, %s18_s19 }
   0x3   :  { %p993_p0 = scmp.ne.s32.totalorder %s18_s19, %s992_s23  ;;  %p998_p2 = scmp.lt.s32.totalorder %s992_s23, %s992_s23 }
   0x5   :  { %p999_p3 = por %p998_p2, %p997_p1 }
   0x7   :  { %p1000_p4 = pnand %p999_p3, %p993_p0 }
   0x9   :  { %1003 = shalt.err (!%p1000_p4)  }
   0xa   :  { %s1110_s24 = smov [#allocation3]   ;;  %s1004_s25 = scalar_lea.vmem %s22_s22, 16 }
   0xb   :  { %20 = dma.vmem_to_smem %s18_s19, 16, %s1110_s24, [#allocation2] }
   0xc   :  { %p1005_p5 = scmp.ne.s32.totalorder %s22_s22, %s1004_s25  ;;  %p1009_p6 = scmp.lt.s32.totalorder %s22_s22, %s22_s22 }
   0xd   :  { %p1010_p7 = scmp.lt.s32.totalorder %s1004_s25, %s1004_s25 }
   0xf   :  { %p1011_p8 = por %p1010_p7, %p1009_p6 }
  0x11   :  { %p1012_p9 = pnand %p1011_p8, %p1005_p5 }
  0x13   :  { %1015 = shalt.err (!%p1012_p9)  }
  0x14   :  { %s1111_s0 = smov [#allocation4]   ;;  %s25_s27 = sshll.u32 %s1373_s2, 4  ;;  %s26_s27 = int_to_ptr.vmem [resolvable:$true] %s25_s27 }
  0x15   :  { %24 = dma.vmem_to_smem %s22_s22, 16, %s1111_s0, [#allocation2] }
  0x16   :  { %s1016_s28 = scalar_lea.vmem %s26_s27, 16  ;;  %p1021_p11 = scmp.lt.s32.totalorder %s26_s27, %s26_s27 }
  0x17   :  { %p1017_p10 = scmp.ne.s32.totalorder %s26_s27, %s1016_s28  ;;  %p1022_p12 = scmp.lt.s32.totalorder %s1016_s28, %s1016_s28 }
  0x19   :  { %p1023_p13 = por %p1022_p12, %p1021_p11 }
  0x1b   :  { %p1024_p0 = pnand %p1023_p13, %p1017_p10 }
  0x1d   :  { %1027 = shalt.err (!%p1024_p0)  }
  0x1e   :  { %s1112_s29 = smov [#allocation5]  }
  0x1f   :  { %28 = dma.vmem_to_smem %s26_s27, 16, %s1112_s29, [#allocation2] }
  0x20   :  { %1080 = dma.done.wait [#allocation2], 48 }
  0x21   :  { %1081 = vsyncadd [#allocation2], 4294967248 }
  0x22   :  { %30 = sfence }
  0x23   :  { %31 = vsyncpa [#allocation7], 0 }
  0x24   :  { %33 = vsyncpa [#allocation7 + $0x1], 0  ;;  %s1187_s30 = smov 0   ;;  %s1189_s12 = smov 0  }
  0x25   :  { %s1191_s2 = smov 0   ;;  %s1193_s13 = smov 0  }
  0x26   :  { %s1195_s14 = smov 0   ;;  %s1197_s15 = smov 0  }
  0x27 LB: > { %1378 = sst [smem:[#allocation10_spill]] %s1096_s2  ;;  %s881_s16 = sadd.s32 4294967295, %s1108_s15   ;;  %s1108_s15 = sphi %s1197_s15, %s39_s15   ;;  %s1104_s14 = sphi %s1195_s14, %s1391_s14   ;;  %s1100_s13 = sphi %s1193_s13, %s1390_s13   ;;  %s1096_s2 = sphi %s1191_s2, %s1389_s2   ;;  %s1092_s12 = sphi %s1189_s12, %s1393_s12   ;;  %s1088_s30 = sphi %s1187_s30, %s1392_s30  }
  0x28   : > { %1379 = sst [smem:[#allocation11_spill]] %s1104_s14  ;;  %s882_s17 = sadd.s32 4294967294, %s1108_s15  }
  0x29   : > { %s51_s18 = sadd.s32 1, %s1104_s14  ;;  %s233_s19 = sadd.s32 1, %s1096_s2 }
  0x2a   : > { %p53_p1 = scmp.ge.s32.totalorder %s51_s18, 2  ;;  %p243_p2 = scmp.ne.s32.totalorder %s1096_s2, %s1092_s12 }
  0x2b   : > { %p244_p3 = scmp.eq.s32.totalorder %s881_s16, 1  ;;  %p249_p4 = scmp.ne.s32.totalorder %s1092_s12, %s1088_s30 }
  0x2c   : > { %s1395_s18 = smov (%p53_p1, %s51_s18), 0  ;;  %p250_p6 = scmp.eq.s32.totalorder %s882_s17, 1 }
  0x2d   : > { %1380 = sst [smem:[#allocation12_spill]] %s1395_s18  ;;  %p1227_p5 = por %p244_p3, %p243_p2 }
  0x2e   : > { %s228_s21 = ssub.s32 %s1104_s14, %s1395_s18  ;;  %p885_p7 = scmp.ge.s32.totalorder %s1108_s15, 1 }
  0x2f   : > { %p231_p8 = scmp.eq.s32.totalorder %s228_s21, 0  ;;  %p1234_p9 = por %p250_p6, %p249_p4 }
  0x30   : > { %p342_p10 = scmp.lt.s32.totalorder %s1108_s15, 3 }
  0x31   : > { %s1382_s22 = scalar_select %p1234_p9, 1, 0 }
  0x32   : > { %s1240_s23 = scalar_select %p231_p8, %s1096_s2, %s233_s19  }
  0x33   : > { %1383 = sst [smem:[#allocation13_spill]] %s1382_s22  ;;  %p343_p11 = pnand %p885_p7, %p342_p10 }
  0x34   : > { %1384 = sst [smem:[#allocation14_spill]] %s1240_s23  ;;  %p402_p12 = scmp.lt.s32.totalorder (!%p343_p11), %s1100_s13, 1  ;;  %v448_v0 = vlaneseq (!%p343_p11)  ;;  %v1113_v1 = vmov (!%p343_p11), 0.0   ;;  %vm1114_vm0 = vmmov (!%p343_p11), 0   ;;  %v1115_v2 = vmov (!%p343_p11), 0   ;;  %v460_v9 = vld [vmem:[%s1368_s8] sm:$0xff] (!%p343_p11) }
  0x35   : > { %346 = sbr.rel (%p343_p11) target bundleno = 330 (0x14a), region = 48  ;;  %s1244_s24 = sld [smem:[#allocation3 + %s1100_s13]] (!%p343_p11)  ;;  %908 = vmatprep.subr.mxu0 (!%p343_p11), %v1113_v1  ;;  %910 = vmatprep.mubr.msk.f32.mxu0 (!%p343_p11), %vm1114_vm0, %v1113_v1  ;;  %vm461_vm1 = vcmask (!%p343_p11), 64512   ;;  %v608_v17 = vld [vmem:[%s1369_s9] sm:$0xff] (!%p343_p11) }
  0x36   : > { %s1247_s25 = sld [smem:[#allocation4 + %s1100_s13]] (!%p343_p11)  ;;  %913 = vmatprep.subr.mxu1 (!%p343_p11), %v1113_v1  ;;  %915 = vmatprep.mubr.msk.f32.mxu1 (!%p343_p11), %vm1114_vm0, %v1113_v1  ;;  %v1258_v3 = vand.u32 (!%p343_p11), 127, %v448_v0  ;;  %v459_v19 = vld [vmem:[%s1367_s7] sm:$0xff] (!%p343_p11)  ;;  %s391_s21 = sand.u32 (!%p343_p11), 1, %s1092_s12  }
  0x37   : > { %s1251_s0 = sld [smem:[#allocation5 + %s1100_s13]] (!%p343_p11)  ;;  %987 = vset.pattern.permute.xlu0 (!%p343_p11), %v1115_v2  ;;  %s886_s27 = sshll.u32 (!%p343_p11), %s391_s21, 3 }
  0x38   : > { %s899_s28 = sshll.u32 (!%p343_p11), %s1100_s13, 7 }
  0x3b   : > { %v443_v6 = vstv (!%p343_p11), %s1244_s24  ;;  %s439_s23 = smul.f32 (!%p343_p11), 0.999999, %s1244_s24 }
  0x3c   : > { %s1254_s1 = scalar_select %p402_p12, %s1100_s13, 1  ;;  %v453_v8 = vstv %s1247_s25 }
  0x3d   : > { %s696_s17 = ssub.s32 %s1251_s0, %s1247_s25  ;;  %vm1283_vm2 = vcmp.lt.s32.totalorder %v1258_v3, %v453_v8  ;;  %s440_s18 = ssub.f32 1.0, %s439_s23 }
  0x3e   : > { %s887_s26 = sshll.u32 %s1254_s1, 3  ;;  %p697_p13 = scmp.gt.s32.totalorder %s696_s17, 0  ;;  %vm893_vm3 = vmneg %vm1283_vm2 }
  0x3f   : > { %s408_s29 = scalar_lea.vmem %s1363_s3, %s887_s26  ;;  %s415_s19 = scalar_lea.vmem %s1364_s4, %s887_s26  ;;  %v441_v15 = vstv %s440_s18 }
  0x40   : > { %v436_v4 = vld [vmem:[%s408_s29] sm:$0xff]  ;;  %s422_s14 = scalar_lea.vmem %s1365_s5, %s887_s26  ;;  %s426_s16 = scalar_lea.vmem %s1366_s6, %s887_s26 }
  0x41   : > { %v437_v5 = vld [vmem:[%s415_s19] sm:$0xff]  ;;  %v444_v13 = vmul.f32 %v443_v6, %v436_v4  ;;  %909 = vmatpush3.msk.msra.mxu0 %vm1283_vm2, %v436_v4  ;;  %s1397_s17 = smov (!%p697_p13, %s696_s17), 0  ;;  %s1116_s29 = smov 1.0  }
  0x42   : > { %v446_v7 = vmul.f32 0.999999, %v437_v5  ;;  %v438_v11 = vld [vmem:[%s422_s14] sm:$0xff]  ;;  %911 = vmatmul.mubr.msk.f32.vlgmr.msra.gmra.mrb[0].mxu0 %vm461_vm1, %v460_v9  ;;  %918 = vmatprep.subr.mxu0 %v1113_v1  ;;  %v442_v16 = vmul.f32 %v441_v15, %v437_v5  ;;  %s897_s22 = sshll.u32 %s1397_s17, 3  ;;  %s1306_s14 = scalar_lea.hbm %s1370_s10, %s899_s28 }
  0x43   : > { %v683_v12 = vld [vmem:[%s426_s16] sm:$0xff]  ;;  %919 = vmatpush3.msra.mxu0 %v438_v11  ;;  %920 = vmatprep.mubr.msk.f32.mxu0 %vm1114_vm0, %v1113_v1  ;;  %s700_s26 = scvt.s32.f32 %s897_s22  ;;  %s393_s16 = scalar_lea.vmem [#allocation6], %s886_s27 }
  0x44   : > { %v447_v14 = vsub.f32 %v436_v4, %v446_v7  ;;  %686 = vperm.xlu0 %987, %v683_v12   ;;  %v445_v18 = vadd.f32 %v444_v13, %v442_v16  ;;  %s739_s17 = sshll.u32 %s393_s16, 4  ;;  %s719_s22 = scalar_lea.sflag [#allocation7], %s391_s21  ;;  %s1308_s17 = int_to_ptr.vmem [resolvable:$true] %s739_s17 }
  0x45   : > { %s701_s19 = smax.f32 %s1116_s29, %s700_s26  ;;  %s1028_s23 = scalar_lea.vmem %s1308_s17, 128 }
  0x46   : > { %921 = vmatmul.mubr.msk.f32.vlgmr.msra.gmra.mrb[2].mxu0 %vm461_vm1, %v608_v17  ;;  %914 = vmatpush3.msk.msra.mxu1 %vm893_vm3, %v445_v18  ;;  %v702_v20 = vstv %s701_s19  ;;  %p1029_p0 = scmp.ne.s32.totalorder %s1308_s17, %s1028_s23  ;;  %s1117_s13 = smov [#allocation6]  }
  0x47   : > { %916 = vmatmul.mubr.msk.f32.vlgmr.msra.gmra.mrb[0].mxu1 %vm461_vm1, %v459_v19  ;;  %988 = vrcp.f32 %v702_v20  ;;  %s1032_s24 = sshll.u32 %s1117_s13, 4  ;;  %s1033_s24 = int_to_ptr.vmem [resolvable:$false] %s1032_s24 }
  0x48   : > { %p1030_p1 = pnand %p1029_p0, %p1227_p5  ;;  %s1034_s26 = scalar_lea.vmem %s1033_s24, 256 }
  0x49   : > { %p1035_p3 = scmp.lt.s32.totalorder %s1308_s17, %s1033_s24  ;;  %p1036_p4 = scmp.lt.s32.totalorder %s1034_s26, %s1028_s23 }
  0x4a   : > { %p1031_p2 = pneg %p1030_p1 }
  0x4b   : > { %p1037_p6 = por %p1036_p4, %p1035_p3 }
  0x4d   : > { %p1038_p7 = pnand %p1037_p6, %p1031_p2 }
  0x51   : > { %v989_v21 = vpop.eup %988 }
  0x52   : > { %923 = vpush %v989_v21 }
  0xc3   : > { %v687_v29 = vpop.permute.xlu0 %686 }
 0x115   : > { %v531_v22 = vpop.f32.mrb[0].mxu0 }
 0x116   : > { %v912_v23 = vpop.f32.mrb[1].mxu0 }
 0x119   : > { %v678_v24 = vpop.f32.mrb[2].mxu0 }
 0x11a   : > { %v922_v25 = vpop.f32.mrb[3].mxu0  ;;  %v604_v26 = vpop.f32.mrb[0].mxu1 }
 0x11b   : > { %v605_v27 = vadd.f32 %v604_v26, %v531_v22  ;;  %v917_v28 = vpop.f32.mrb[1].mxu1 }
 0x11d   : > { %v682_v30 = vadd.f32 %v678_v24, %v605_v27 }
 0x11f   : > { %v689_v31 = vadd.f32 %v687_v29, %v682_v30 }
 0x121   : > { %990 = vtanh.f32 %v689_v31 }
 0x12b   : > { %v991_v32 = vpop.eup %990 }
 0x12c   : > { %v691_v33 = vsub.f32 %v991_v32, %v447_v14  ;;  %v716_v34 = vadd.f32 %v991_v32, %v446_v7 }
 0x12e   : > { %v707_v35 = vmul.f32 %v691_v33, %v691_v33  ;;  %717 = vst [vmem:[%s393_s16] sm:$0xff] %v716_v34 }
 0x12f   : > { %1041 = shalt.err (!%p1038_p7)
}
 0x130   : > { %s1042_s29 = scalar_lea.hbm %s1306_s14, 128  ;;  %s1046_s27 = scalar_lea.hbm %s1370_s10, 256 }
 0x131   : > { %p1043_p8 = scmp.ne.s32.totalorder %s1306_s14, %s1042_s29  ;;  %p1047_p12 = scmp.lt.u32.totalorder %s1306_s14, %s1370_s10 }
 0x132   : > { %p1048_p13 = scmp.lt.u32.totalorder %s1046_s27, %s1042_s29  ;;  %p1050_p1 = scmp.lt.u32.totalorder %s1042_s29, %s1306_s14 }
 0x133   : > { %p1044_p10 = pnand %p1043_p8, %p1227_p5 }
 0x134   : > { %p1049_p0 = por %p1048_p13, %p1047_p12 }
 0x135   : > { %p1045_p11 = pneg %p1044_p10 }
 0x136   : > { %p1051_p2 = por %p1050_p1, %p1049_p0 }
 0x138   : > { %p1052_p3 = pnand %p1051_p2, %p1045_p11 }
 0x13a   : > { %1055 = shalt.err (!%p1052_p3)
}
 0x13b   : > { %925 = dma.vmem_to_hbm [thread:$0]  (%p1227_p5), %s1308_s17, 128, %s1306_s14, %s719_s22   ;;  %v693_v36 = vstv %s1251_s0  ;;  %v708_v37 = vrot.slane %v707_v35, 4  ;;  %vm692_vm4 = vcmp.ge.s32.totalorder %v1258_v3, %v453_v8 }
 0x13c   : > { %vm694_vm5 = vcmp.lt.s32.totalorder %v1258_v3, %v693_v36  ;;  %s924_s18 = spop %923  ;;  %s432_s17 = scalar_lea.vmem %s1371_s11, %s1254_s1 }
 0x13d   : > { %v709_v38 = vadd.f32 %v708_v37, %v707_v35  ;;  %vm695_vm6 = vmand %vm692_vm4, %vm694_vm5  ;;  %v705_v40 = vstv %s924_s18 }
 0x13e   : > { %v706_v43 = vsel %vm695_vm6, %v705_v40, 0.0 }
 0x13f   : > { %v710_v39 = vrot.slane %v709_v38, 2 }
 0x141   : > { %v711_v41 = vadd.f32 %v710_v39, %v709_v38 }
 0x143   : > { %v712_v42 = vrot.slane %v711_v41, 1 }
 0x145   : > { %v713_v44 = vadd.f32 %v712_v42, %v711_v41 }
 0x147   : > { %v714_v45 = vmul.f32 %v713_v44, %v706_v43 }
 0x149   : > { %715 = vst [vmem:[%s432_s17] sm:$0x1] %v714_v45 }
 0x14a PF: > { %p931_p5 = scmp.ge.s32.totalorder %s1108_s15, 2  ;;  %s754_s0 = sand.u32 1, %s1088_s30  }
 0x14b   : > { %s755_s14 = scalar_lea.sflag [#allocation7], %s754_s0 }
 0x14c   : > { %p928_p4 = pnand %p931_p5, %p1234_p9 }
 0x14e   : > { %1083 = dma.done.wait (!%p928_p4), %s755_s14, 128  }
 0x14f   : > { %1085 = vsyncadd (!%p928_p4), %s755_s14, 4294967168  ;;  %s39_s15 = sadd.s32 1, %s1108_s15   ;;  %s1388_s22 = sld [smem:[#allocation10_spill]] }
 0x150   : > { %p36_p6 = scmp.ge.s32.totalorder %s39_s15, 4   ;;  %s1389_s2 = sld [smem:[#allocation14_spill]] }
 0x151   : > { %s1390_s13 = sld [smem:[#allocation11_spill]]  ;;  %s1391_s14 = sld [smem:[#allocation12_spill]] }
 0x152   : > { %s1392_s30 = smov %s1092_s12  ;;  %38 = sbr.rel (!%p36_p6) target bundleno = 39 (0x27), region = 104 }
 0x155   : > { %s1393_s12 = smov %s1388_s22 }
 0x159   :  { %769 = vsyncpa [#allocation7], 1 }
 0x15a   :  { %771 = vsyncpa [#allocation7 + $0x1], 1 }

</bundles_post_ra>
